<compile_context>
chip_gen: v5e
topology: v5e:2x2
jax: 0.10.0
libtpu: 0.0.40
codegen_flags: <defaults>
</compile_context>

<pallas_src>
import math
import jax
import jax.numpy as jnp
from jax.experimental import pallas as pl
from jax.experimental.pallas import tpu as pltpu

LANE = 128        # padded feature width (every hidden width in this MLP is <= 128)
N_LAYERS = 7
K0_MIN = 16       # layer-0 K padded to one bf16 sublane tile (16 rows)


def _round_up(x, m):
    return ((x + m - 1) // m) * m


def _num_tensorcores():
    """2 TensorCores per chip on v7x, 1 on v5e/v6e.  Defensive: default to 1."""
    try:
        kind = jax.devices()[0].device_kind.lower()
    except Exception:
        return 1
    return 2 if "7" in kind else 1


def dqn_kernel(x_ref, w0_ref, w_ref, b_ref, out_ref):
    """One batch-tile of the full 7-layer MLP.

    x_ref  : (batch_tile, K0) f32   -- activations, zero-padded cols >= n_obs
    w0_ref : (K0, 128)       bf16   -- layer-0 weight, zero-padded, VMEM-resident
    w_ref  : (6, 128, 128)   bf16   -- layers 1..6 weights, zero-padded, resident
    b_ref  : (8, 128)        f32    -- row i = bias of layer i, zero-padded
    out_ref: (batch_tile, 128) f32  -- lane-dense output (cols >= n_actions are 0)

    Zero padding is self-consistent: padded weight rows/cols and bias lanes are 0,
    so padded activation lanes stay exactly 0 through every layer.
    bf16 operands feed the MXU; accumulation, bias-add and ReLU stay f32.
    """
    # Layer 0: (bt, K0) @ (K0, 128)
    h = jnp.dot(x_ref[...].astype(jnp.bfloat16), w0_ref[...],
                preferred_element_type=jnp.float32)
    h = h + b_ref[0:1, :]
    h = jnp.maximum(h, 0.0)

    # Layers 1..6: (bt, 128) @ (128, 128), static unroll (LLO sees the full chain).
    for i in range(1, N_LAYERS):
        h = jnp.dot(h.astype(jnp.bfloat16), w_ref[i - 1],
                    preferred_element_type=jnp.float32)
        h = h + b_ref[i:i + 1, :]
        if i < N_LAYERS - 1:
            h = jnp.maximum(h, 0.0)         # ReLU on all but the last layer

    out_ref[...] = h


def dqn_forward(x, w0_pack, w_pack, b_pack, n_actions, *, batch_tile=None):
    """x: (batch, n_obs) f32.  w0_pack: (K0,128) bf16.  w_pack: (6,128,128) bf16.
    b_pack: (8,128) f32.  Returns (batch, n_actions) f32."""
    batch, n_obs = x.shape
    k0 = w0_pack.shape[0]

    # Generation-aware tiling: 1 grid step on single-TC (v5e/v6e), 2 on dual-TC v7x.
    batch8 = _round_up(batch, 8)
    if batch_tile is None:
        ntc = _num_tensorcores()
        batch_tile = _round_up(pl.cdiv(batch8, ntc), 8)
    steps = pl.cdiv(batch8, batch_tile)
    batch_pad = steps * batch_tile

    # Pad activations only to (batch_pad, K0) — K0 is 16, not 128, so x HBM traffic
    # stays small.  Padded rows/lanes are zero and stay zero through the network.
    x_pad = jnp.zeros((batch_pad, k0), jnp.float32).at[:batch, :n_obs].set(x)

    # Untiled VMEM specs: each packed parameter buffer is DMA'd into VMEM once and
    # stays resident (single-buffered, no per-grid-step re-fetch).
    vmem_resident = pl.BlockSpec(memory_space=pltpu.MemorySpace.VMEM)

    flops = 2 * batch_pad * (k0 * LANE + (N_LAYERS - 1) * LANE * LANE)
    bytes_accessed = (x_pad.size * x_pad.dtype.itemsize
                      + w0_pack.size * w0_pack.dtype.itemsize
                      + w_pack.size * w_pack.dtype.itemsize
                      + b_pack.size * b_pack.dtype.itemsize
                      + batch_pad * LANE * 4)

    out_pad = pl.pallas_call(
        dqn_kernel,
        out_shape=jax.ShapeDtypeStruct((batch_pad, LANE), jnp.float32),
        grid=(steps,),
        in_specs=[
            pl.BlockSpec((batch_tile, k0), lambda i: (i, 0)),   # x: tiled over batch
            vmem_resident,                                      # layer-0 weight
            vmem_resident,                                      # packed weights 1..6
            vmem_resident,                                      # packed biases
        ],
        out_specs=pl.BlockSpec((batch_tile, LANE), lambda i: (i, 0)),  # lane-dense
        compiler_params=pltpu.CompilerParams(
            dimension_semantics=("parallel",)),                 # TC sharding on v7x
        cost_estimate=pl.CostEstimate(
            flops=flops, transcendentals=0, bytes_accessed=bytes_accessed),
    )(x_pad, w0_pack, w_pack, b_pack)

    # Undo batch padding and the lane-dense output padding in the wrapper.
    return out_pad[:batch, :n_actions]


def init_linear(key, fan_in, fan_out):
    """PyTorch-style uniform(-1/sqrt(fan_in), 1/sqrt(fan_in)) init, stored as (in, out)."""
    kw, kb = jax.random.split(key)
    bound = 1.0 / math.sqrt(fan_in)
    w = jax.random.uniform(kw, (fan_in, fan_out), jnp.float32, -bound, bound)
    b = jax.random.uniform(kb, (fan_out,), jnp.float32, -bound, bound)
    return w, b


def pack_params(params):
    """Pack per-layer (W(in,out), b(out,)) into:
       w0_pack: (K0,128) bf16 layer-0 weight (K0 = n_obs rounded up to 16),
       w_pack : (6,128,128) bf16 layers 1..6, zero-padded,
       b_pack : (8,128) f32, row i = bias of layer i, zero-padded."""
    w0, b0 = params[0]
    k0 = _round_up(max(w0.shape[0], K0_MIN), K0_MIN)
    w0_pack = (jnp.zeros((k0, LANE), jnp.bfloat16)
               .at[:w0.shape[0], :w0.shape[1]].set(w0.astype(jnp.bfloat16)))
    w_pack = jnp.zeros((N_LAYERS - 1, LANE, LANE), jnp.bfloat16)
    b_pack = jnp.zeros((8, LANE), jnp.float32)
    b_pack = b_pack.at[0, :b0.shape[0]].set(b0)
    for i, (w, b) in enumerate(params[1:], start=1):
        fi, fo = w.shape
        w_pack = w_pack.at[i - 1, :fi, :fo].set(w.astype(jnp.bfloat16))
        b_pack = b_pack.at[i, :fo].set(b)
    return w0_pack, w_pack, b_pack


if __name__ == "__main__":
    key = jax.random.PRNGKey(0)

    batch = 128          # typical DQN replay-batch size
    n_observations = 4
    n_actions = 2

    # layer sizes following the PyTorch forward pass exactly:
    # n_obs->32, 32->64, 64->128, 128->128, 128->64, 64->32, 32->n_actions
    dims = [(n_observations, 32), (32, 64), (64, 128), (128, 128),
            (128, 64), (64, 32), (32, n_actions)]

    keys = jax.random.split(key, len(dims) + 1)
    params = [init_linear(keys[i], fi, fo) for i, (fi, fo) in enumerate(dims)]
    x = jax.random.normal(keys[-1], (batch, n_observations), jnp.float32)

    w0_pack, w_pack, b_pack = pack_params(params)

    out = dqn_forward(x, w0_pack, w_pack, b_pack, n_actions)
    out = jax.block_until_ready(out)

    # Reference in plain JAX with the same bf16-operand / f32-accumulate math
    # (zero padding is self-consistent, so unpadded params give identical results).
    h = x
    for i, (w, b) in enumerate(params):
        h = jnp.dot(h.astype(jnp.bfloat16), w.astype(jnp.bfloat16),
                    preferred_element_type=jnp.float32) + b[None, :]
        if i < N_LAYERS - 1:
            h = jnp.maximum(h, 0.0)
    ref = h

    assert out.shape == (batch, n_actions)
    assert jnp.allclose(out, ref, atol=1e-2, rtol=1e-2), "mismatch vs reference"
    # TODO(synk): select_action (epsilon-greedy + env action sampling) is host-side
    # control flow around the network output, not part of the forward kernel.
    print("KERNEL_OK")
</pallas_src>

<mosaic_0001>
module attributes {stable_mosaic.version = 11 : i64} {
  func.func @dqn_kernel(%arg0: i32, %arg1: memref<128x16xf32, #tpu.memory_space<vmem>>, %arg2: memref<16x128xbf16, #tpu.memory_space<vmem>>, %arg3: memref<6x128x128xbf16, #tpu.memory_space<vmem>>, %arg4: memref<8x128xf32, #tpu.memory_space<vmem>>, %arg5: memref<128x128xf32, #tpu.memory_space<vmem>>) attributes {dimension_semantics = [#tpu.dimension_semantics<parallel>], iteration_bounds = array<i64: 1>, scalar_prefetch = 0 : i64, scratch_operands = 0 : i64, tpu.core_type = #tpu.core_type<tc>, window_params = [{transform_indices = @transform_0, window_bounds = array<i64: 128, 16>}, {pipeline_mode = #tpu.pipeline_mode<synchronous>, transform_indices = @transform_1, window_bounds = array<i64: 16, 128>}, {pipeline_mode = #tpu.pipeline_mode<synchronous>, transform_indices = @transform_2, window_bounds = array<i64: 6, 128, 128>}, {pipeline_mode = #tpu.pipeline_mode<synchronous>, transform_indices = @transform_3, window_bounds = array<i64: 8, 128>}, {transform_indices = @transform_4, window_bounds = array<i64: 128, 128>}]} {
    %c0 = arith.constant 0 : index
    %c0_0 = arith.constant 0 : index
    %0 = vector.load %arg1[%c0, %c0_0] : memref<128x16xf32, #tpu.memory_space<vmem>>, vector<128x16xf32>
    %1 = arith.truncf %0 : vector<128x16xf32> to vector<128x16xbf16>
    %c0_1 = arith.constant 0 : index
    %c0_2 = arith.constant 0 : index
    %2 = vector.load %arg2[%c0_1, %c0_2] : memref<16x128xbf16, #tpu.memory_space<vmem>>, vector<16x128xbf16>
    %cst = arith.constant dense<0.000000e+00> : vector<128x128xf32>
    %3 = tpu.matmul %1, %2, %cst {dimension_numbers = #tpu.dot_dimension_numbers<[1], [0], [0], [1], [0, 0, 1, 1], [], []>} : vector<128x16xbf16>, vector<16x128xbf16>, vector<128x128xf32> -> vector<128x128xf32>
    %c0_3 = arith.constant 0 : index
    %c0_4 = arith.constant 0 : index
    %4 = vector.load %arg4[%c0_3, %c0_4] : memref<8x128xf32, #tpu.memory_space<vmem>>, vector<1x128xf32>
    %5 = vector.broadcast %4 : vector<1x128xf32> to vector<128x128xf32>
    %6 = arith.addf %3, %5 : vector<128x128xf32>
    %cst_5 = arith.constant 0.000000e+00 : f32
    %7 = vector.broadcast %cst_5 : f32 to vector<128x128xf32>
    %8 = arith.maximumf %6, %7 : vector<128x128xf32>
    %9 = arith.truncf %8 : vector<128x128xf32> to vector<128x128xbf16>
    %c0_6 = arith.constant 0 : index
    %c0_7 = arith.constant 0 : index
    %c0_8 = arith.constant 0 : index
    %10 = vector.load %arg3[%c0_6, %c0_7, %c0_8] : memref<6x128x128xbf16, #tpu.memory_space<vmem>>, vector<1x128x128xbf16>
    %11 = vector.shape_cast %10 : vector<1x128x128xbf16> to vector<128x128xbf16>
    %cst_9 = arith.constant dense<0.000000e+00> : vector<128x128xf32>
    %12 = tpu.matmul %9, %11, %cst_9 {dimension_numbers = #tpu.dot_dimension_numbers<[1], [0], [0], [1], [0, 0, 1, 1], [], []>} : vector<128x128xbf16>, vector<128x128xbf16>, vector<128x128xf32> -> vector<128x128xf32>
    %c1 = arith.constant 1 : index
    %c0_10 = arith.constant 0 : index
    %13 = vector.load %arg4[%c1, %c0_10] : memref<8x128xf32, #tpu.memory_space<vmem>>, vector<1x128xf32>
    %14 = vector.broadcast %13 : vector<1x128xf32> to vector<128x128xf32>
    %15 = arith.addf %12, %14 : vector<128x128xf32>
    %cst_11 = arith.constant 0.000000e+00 : f32
    %16 = vector.broadcast %cst_11 : f32 to vector<128x128xf32>
    %17 = arith.maximumf %15, %16 : vector<128x128xf32>
    %18 = arith.truncf %17 : vector<128x128xf32> to vector<128x128xbf16>
    %c1_12 = arith.constant 1 : index
    %c0_13 = arith.constant 0 : index
    %c0_14 = arith.constant 0 : index
    %19 = vector.load %arg3[%c1_12, %c0_13, %c0_14] : memref<6x128x128xbf16, #tpu.memory_space<vmem>>, vector<1x128x128xbf16>
    %20 = vector.shape_cast %19 : vector<1x128x128xbf16> to vector<128x128xbf16>
    %cst_15 = arith.constant dense<0.000000e+00> : vector<128x128xf32>
    %21 = tpu.matmul %18, %20, %cst_15 {dimension_numbers = #tpu.dot_dimension_numbers<[1], [0], [0], [1], [0, 0, 1, 1], [], []>} : vector<128x128xbf16>, vector<128x128xbf16>, vector<128x128xf32> -> vector<128x128xf32>
    %c2 = arith.constant 2 : index
    %c0_16 = arith.constant 0 : index
    %22 = vector.load %arg4[%c2, %c0_16] : memref<8x128xf32, #tpu.memory_space<vmem>>, vector<1x128xf32>
    %23 = vector.broadcast %22 : vector<1x128xf32> to vector<128x128xf32>
    %24 = arith.addf %21, %23 : vector<128x128xf32>
    %cst_17 = arith.constant 0.000000e+00 : f32
    %25 = vector.broadcast %cst_17 : f32 to vector<128x128xf32>
    %26 = arith.maximumf %24, %25 : vector<128x128xf32>
    %27 = arith.truncf %26 : vector<128x128xf32> to vector<128x128xbf16>
    %c2_18 = arith.constant 2 : index
    %c0_19 = arith.constant 0 : index
    %c0_20 = arith.constant 0 : index
    %28 = vector.load %arg3[%c2_18, %c0_19, %c0_20] : memref<6x128x128xbf16, #tpu.memory_space<vmem>>, vector<1x128x128xbf16>
    %29 = vector.shape_cast %28 : vector<1x128x128xbf16> to vector<128x128xbf16>
    %cst_21 = arith.constant dense<0.000000e+00> : vector<128x128xf32>
    %30 = tpu.matmul %27, %29, %cst_21 {dimension_numbers = #tpu.dot_dimension_numbers<[1], [0], [0], [1], [0, 0, 1, 1], [], []>} : vector<128x128xbf16>, vector<128x128xbf16>, vector<128x128xf32> -> vector<128x128xf32>
    %c3 = arith.constant 3 : index
    %c0_22 = arith.constant 0 : index
    %31 = vector.load %arg4[%c3, %c0_22] : memref<8x128xf32, #tpu.memory_space<vmem>>, vector<1x128xf32>
    %32 = vector.broadcast %31 : vector<1x128xf32> to vector<128x128xf32>
    %33 = arith.addf %30, %32 : vector<128x128xf32>
    %cst_23 = arith.constant 0.000000e+00 : f32
    %34 = vector.broadcast %cst_23 : f32 to vector<128x128xf32>
    %35 = arith.maximumf %33, %34 : vector<128x128xf32>
    %36 = arith.truncf %35 : vector<128x128xf32> to vector<128x128xbf16>
    %c3_24 = arith.constant 3 : index
    %c0_25 = arith.constant 0 : index
    %c0_26 = arith.constant 0 : index
    %37 = vector.load %arg3[%c3_24, %c0_25, %c0_26] : memref<6x128x128xbf16, #tpu.memory_space<vmem>>, vector<1x128x128xbf16>
    %38 = vector.shape_cast %37 : vector<1x128x128xbf16> to vector<128x128xbf16>
    %cst_27 = arith.constant dense<0.000000e+00> : vector<128x128xf32>
    %39 = tpu.matmul %36, %38, %cst_27 {dimension_numbers = #tpu.dot_dimension_numbers<[1], [0], [0], [1], [0, 0, 1, 1], [], []>} : vector<128x128xbf16>, vector<128x128xbf16>, vector<128x128xf32> -> vector<128x128xf32>
    %c4 = arith.constant 4 : index
    %c0_28 = arith.constant 0 : index
    %40 = vector.load %arg4[%c4, %c0_28] : memref<8x128xf32, #tpu.memory_space<vmem>>, vector<1x128xf32>
    %41 = vector.broadcast %40 : vector<1x128xf32> to vector<128x128xf32>
    %42 = arith.addf %39, %41 : vector<128x128xf32>
    %cst_29 = arith.constant 0.000000e+00 : f32
    %43 = vector.broadcast %cst_29 : f32 to vector<128x128xf32>
    %44 = arith.maximumf %42, %43 : vector<128x128xf32>
    %45 = arith.truncf %44 : vector<128x128xf32> to vector<128x128xbf16>
    %c4_30 = arith.constant 4 : index
    %c0_31 = arith.constant 0 : index
    %c0_32 = arith.constant 0 : index
    %46 = vector.load %arg3[%c4_30, %c0_31, %c0_32] : memref<6x128x128xbf16, #tpu.memory_space<vmem>>, vector<1x128x128xbf16>
    %47 = vector.shape_cast %46 : vector<1x128x128xbf16> to vector<128x128xbf16>
    %cst_33 = arith.constant dense<0.000000e+00> : vector<128x128xf32>
    %48 = tpu.matmul %45, %47, %cst_33 {dimension_numbers = #tpu.dot_dimension_numbers<[1], [0], [0], [1], [0, 0, 1, 1], [], []>} : vector<128x128xbf16>, vector<128x128xbf16>, vector<128x128xf32> -> vector<128x128xf32>
    %c5 = arith.constant 5 : index
    %c0_34 = arith.constant 0 : index
    %49 = vector.load %arg4[%c5, %c0_34] : memref<8x128xf32, #tpu.memory_space<vmem>>, vector<1x128xf32>
    %50 = vector.broadcast %49 : vector<1x128xf32> to vector<128x128xf32>
    %51 = arith.addf %48, %50 : vector<128x128xf32>
    %cst_35 = arith.constant 0.000000e+00 : f32
    %52 = vector.broadcast %cst_35 : f32 to vector<128x128xf32>
    %53 = arith.maximumf %51, %52 : vector<128x128xf32>
    %54 = arith.truncf %53 : vector<128x128xf32> to vector<128x128xbf16>
    %c5_36 = arith.constant 5 : index
    %c0_37 = arith.constant 0 : index
    %c0_38 = arith.constant 0 : index
    %55 = vector.load %arg3[%c5_36, %c0_37, %c0_38] : memref<6x128x128xbf16, #tpu.memory_space<vmem>>, vector<1x128x128xbf16>
    %56 = vector.shape_cast %55 : vector<1x128x128xbf16> to vector<128x128xbf16>
    %cst_39 = arith.constant dense<0.000000e+00> : vector<128x128xf32>
    %57 = tpu.matmul %54, %56, %cst_39 {dimension_numbers = #tpu.dot_dimension_numbers<[1], [0], [0], [1], [0, 0, 1, 1], [], []>} : vector<128x128xbf16>, vector<128x128xbf16>, vector<128x128xf32> -> vector<128x128xf32>
    %c6 = arith.constant 6 : index
    %c0_40 = arith.constant 0 : index
    %58 = vector.load %arg4[%c6, %c0_40] : memref<8x128xf32, #tpu.memory_space<vmem>>, vector<1x128xf32>
    %59 = vector.broadcast %58 : vector<1x128xf32> to vector<128x128xf32>
    %60 = arith.addf %57, %59 : vector<128x128xf32>
    %c0_41 = arith.constant 0 : index
    %c0_42 = arith.constant 0 : index
    %61 = vector.load %arg5[%c0_41, %c0_42] : memref<128x128xf32, #tpu.memory_space<vmem>>, vector<128x128xf32>
    tpu.vector_store %arg5[%c0_41, %c0_42], %60 {strides = array<i32>} : memref<128x128xf32, #tpu.memory_space<vmem>>, vector<128x128xf32>,
    return
  }
  func.func @transform_0(%arg0: i32) -> (i32, i32) {
    %c0_i32 = arith.constant 0 : i32
    %c0_i32_0 = arith.constant 0 : i32
    return %arg0, %c0_i32 : i32, i32
  }
  func.func @transform_1(%arg0: i32) -> (i32, i32) {
    %c0_i32 = arith.constant 0 : i32
    %c0_i32_0 = arith.constant 0 : i32
    %c0_i32_1 = arith.constant 0 : i32
    return %c0_i32, %c0_i32_0 : i32, i32
  }
  func.func @transform_2(%arg0: i32) -> (i32, i32, i32) {
    %c0_i32 = arith.constant 0 : i32
    %c0_i32_0 = arith.constant 0 : i32
    %c0_i32_1 = arith.constant 0 : i32
    %c0_i32_2 = arith.constant 0 : i32
    return %c0_i32, %c0_i32_0, %c0_i32_1 : i32, i32, i32
  }
  func.func @transform_3(%arg0: i32) -> (i32, i32) {
    %c0_i32 = arith.constant 0 : i32
    %c0_i32_0 = arith.constant 0 : i32
    %c0_i32_1 = arith.constant 0 : i32
    return %c0_i32, %c0_i32_0 : i32, i32
  }
  func.func @transform_4(%arg0: i32) -> (i32, i32) {
    %c0_i32 = arith.constant 0 : i32
    %c0_i32_0 = arith.constant 0 : i32
    return %arg0, %c0_i32 : i32, i32
  }
}

</mosaic_0001>

<bundles_post_ra>
// kernel: tpu_custom_call.1
= control target key start
LH: loop header
LB: loop body
LE: loop exit
PB: predicated region body
PF: predicated region fallthrough
CT: control target
= control target key end

     0   :  { %9 = vsyncpa [#allocation3], 0  ;;  %s1558_s0 = inlined_call_operand.vmem [shape: f32[128,16], index: 0, kind: input, shape index: {}]   ;;  %s1559_s1 = inlined_call_operand.vmem [shape: bf16[16,128], index: 1, kind: input, shape index: {}]   ;;  %s1560_s2 = inlined_call_operand.hbm [shape: bf16[6,128,128], index: 2, kind: input, shape index: {}]   ;;  %s1561_s3 = inlined_call_operand.vmem [shape: f32[8,128], index: 3, kind: input, shape index: {}]   ;;  %s1562_s4 = inlined_call_operand.hbm [shape: f32[128,128], index: 4, kind: output, shape index: {}]  }
   0x1   :  { %10 = vsyncpa [#allocation4], 0  ;;  %s19_s17 = sshll.u32 %s1560_s2, 4  ;;  %s1351_s18 = smov [#allocation2]   ;;  %s20_s17 = int_to_ptr.hbm [resolvable:$true] %s19_s17 }
   0x2   :  { %s21_s19 = sshll.u32 %s1351_s18, 4  ;;  %s1352_s20 = smov 64   ;;  %s22_s19 = int_to_ptr.vmem [resolvable:$true] %s21_s19 }
   0x3   :  { %s1353_s21 = smov 4  }
   0x4   :  { %27 = dma.hbm_to_vmem [thread:$0]  %s20_s17, 6144, %s22_s19, [#allocation3], %s1352_s20, %s1352_s20, %s1353_s21  }
   0x5   :  { %1347 = dma.done.wait [#allocation3], 6144  }
   0x6   :  { %1348 = vsyncadd [#allocation3], 4294961152  ;;  %v1221_v0 = vld [vmem:[%s1559_s1] sm:$0xff]  ;;  %v36_v2 = vld [vmem:[%s1558_s0 + $0x8] sm:$0xff]  ;;  %vm69_vm0 = vcmask 130048   ;;  %s1004_s16 = sshll.u32 %s1562_s4, 4  ;;  %s1005_s16 = int_to_ptr.hbm [resolvable:$true] %s1004_s16 }
   0x7   :  { %v35_v1 = vld [vmem:[%s1558_s0] sm:$0xff]  ;;  %101 = vmatpush.bf16.msra.mxu0 %v1221_v0  ;;  %v37_v4 = vld [vmem:[%s1558_s0 + $0x10] sm:$0xff]  ;;  %v38_v5 = vld [vmem:[%s1558_s0 + $0x18] sm:$0xff]  ;;  %s1355_s17 = smov 128   ;;  %s1356_s18 = smov 8  }
   0x8   :  { %v51_v3 = vpack.c.bf16 %v36_v2, %v35_v1  ;;  %v52_v6 = vpack.c.bf16 %v38_v5, %v37_v4  ;;  %v39_v7 = vld [vmem:[%s1558_s0 + $0x20] sm:$0xff]  ;;  %v40_v8 = vld [vmem:[%s1558_s0 + $0x28] sm:$0xff]  ;;  %v41_v10 = vld [vmem:[%s1558_s0 + $0x30] sm:$0xff] }
   0x9   :  { %v53_v9 = vpack.c.bf16 %v40_v8, %v39_v7  ;;  %v42_v11 = vld [vmem:[%s1558_s0 + $0x38] sm:$0xff]  ;;  %v43_v13 = vld [vmem:[%s1558_s0 + $0x40] sm:$0xff]  ;;  %v44_v14 = vld [vmem:[%s1558_s0 + $0x48] sm:$0xff] }
   0xa   :  { %1021 = vmatmul.msk.bf16.vlgmr.msra.gmra.mxu0 %vm69_vm0, %v51_v3  ;;  %v54_v12 = vpack.c.bf16 %v42_v11, %v41_v10  ;;  %v55_v15 = vpack.c.bf16 %v44_v14, %v43_v13  ;;  %v1229_v16 = vld [vmem:[#allocation2 + $0x38] sm:$0xff]  ;;  %v45_v17 = vld [vmem:[%s1558_s0 + $0x50] sm:$0xff]  ;;  %v1227_v21 = vld [vmem:[#allocation2 + $0x28] sm:$0xff] }
   0xb   :  { %233 = vmatpush.bf16.msra.mxu1 %v1229_v16  ;;  %1270 = vmatpush.bf16.msra.mxu3 %v1229_v16  ;;  %v46_v18 = vld [vmem:[%s1558_s0 + $0x58] sm:$0xff]  ;;  %v1228_v20 = vld [vmem:[#allocation2 + $0x30] sm:$0xff]  ;;  %v1226_v22 = vld [vmem:[#allocation2 + $0x20] sm:$0xff] }
   0xc   :  { %v56_v19 = vpack.c.bf16 %v46_v18, %v45_v17  ;;  %v47_v23 = vld [vmem:[%s1558_s0 + $0x60] sm:$0xff]  ;;  %v48_v24 = vld [vmem:[%s1558_s0 + $0x68] sm:$0xff]  ;;  %v1225_v25 = vld [vmem:[#allocation2 + $0x18] sm:$0xff] }
   0xd   :  { %v57_v26 = vpack.c.bf16 %v48_v24, %v47_v23  ;;  %v1224_v27 = vld [vmem:[#allocation2 + $0x10] sm:$0xff]  ;;  %v1223_v28 = vld [vmem:[#allocation2 + $0x8] sm:$0xff]  ;;  %v1222_v29 = vld [vmem:[#allocation2] sm:$0xff] }
   0xe   :  { %v49_v30 = vld [vmem:[%s1558_s0 + $0x70] sm:$0xff]  ;;  %v50_v31 = vld [vmem:[%s1558_s0 + $0x78] sm:$0xff]  ;;  %v1447_v34 = vld [vmem:[%s1561_s3] ss:$0 sm:$0xff] }
   0xf   :  { %234 = vmatpush.bf16.msra.mxu1 %v1228_v20  ;;  %1271 = vmatpush.bf16.msra.mxu3 %v1228_v20  ;;  %v58_v32 = vpack.c.bf16 %v50_v31, %v49_v30  ;;  %v1236_v13 = vld [vmem:[#allocation2 + $0x70] sm:$0xff]  ;;  %v1234_v16 = vld [vmem:[#allocation2 + $0x60] sm:$0xff]  ;;  %v1233_v20 = vld [vmem:[#allocation2 + $0x58] sm:$0xff] }
  0x10   :  { %v1232_v24 = vld [vmem:[#allocation2 + $0x50] sm:$0xff] }
  0x13   :  { %235 = vmatpush.bf16.msra.mxu1 %v1227_v21  ;;  %1272 = vmatpush.bf16.msra.mxu3 %v1227_v21 }
  0x17   :  { %236 = vmatpush.bf16.msra.mxu1 %v1226_v22  ;;  %1273 = vmatpush.bf16.msra.mxu3 %v1226_v22 }
  0x1a   :  { %1022 = vmatmul.msk.bf16.gmra.mxu0 %vm69_vm0, %v52_v6 }
  0x1b   :  { %237 = vmatpush.bf16.msra.mxu1 %v1225_v25  ;;  %1274 = vmatpush.bf16.msra.mxu3 %v1225_v25 }
  0x1f   :  { %238 = vmatpush.bf16.msra.mxu1 %v1224_v27  ;;  %1275 = vmatpush.bf16.msra.mxu3 %v1224_v27  ;;  %v1230_v27 = vld [vmem:[#allocation2 + $0x40] sm:$0xff] }
  0x23   :  { %239 = vmatpush.bf16.msra.mxu1 %v1223_v28  ;;  %1276 = vmatpush.bf16.msra.mxu3 %v1223_v28 }
  0x27   :  { %240 = vmatpush.bf16.msra.mxu1 %v1222_v29  ;;  %1277 = vmatpush.bf16.msra.mxu3 %v1222_v29 }
  0x2a   :  { %1023 = vmatmul.msk.bf16.gmra.mxu0 %vm69_vm0, %v53_v9  ;;  %v1237_v9 = vld [vmem:[#allocation2 + $0x78] sm:$0xff] }
  0x2b   :  { %373 = vmatpush.bf16.msrb.mxu1 %v1237_v9  ;;  %1278 = vmatpush.bf16.msra.mxu2 %v1237_v9 }
  0x2f   :  { %374 = vmatpush.bf16.msrb.mxu1 %v1236_v13  ;;  %1279 = vmatpush.bf16.msra.mxu2 %v1236_v13 }
  0x3a   :  { %1024 = vmatmul.msk.bf16.gmra.mxu0 %vm69_vm0, %v54_v12 }
  0x4a   :  { %1025 = vmatmul.msk.bf16.gmra.mxu0 %vm69_vm0, %v55_v15  ;;  %v1235_v15 = vld [vmem:[#allocation2 + $0x68] sm:$0xff] }
  0x4b   :  { %375 = vmatpush.bf16.msrb.mxu1 %v1235_v15  ;;  %1280 = vmatpush.bf16.msra.mxu2 %v1235_v15 }
  0x4f   :  { %376 = vmatpush.bf16.msrb.mxu1 %v1234_v16  ;;  %1281 = vmatpush.bf16.msra.mxu2 %v1234_v16 }
  0x53   :  { %377 = vmatpush.bf16.msrb.mxu1 %v1233_v20  ;;  %1282 = vmatpush.bf16.msra.mxu2 %v1233_v20 }
  0x57   :  { %378 = vmatpush.bf16.msrb.mxu1 %v1232_v24  ;;  %1283 = vmatpush.bf16.msra.mxu2 %v1232_v24 }
  0x5a   :  { %1026 = vmatmul.msk.bf16.gmra.mxu0 %vm69_vm0, %v56_v19 }
  0x6a   :  { %1027 = vmatmul.msk.bf16.gmra.mxu0 %vm69_vm0, %v57_v26  ;;  %v1231_v26 = vld [vmem:[#allocation2 + $0x48] sm:$0xff] }
  0x6b   :  { %379 = vmatpush.bf16.msrb.mxu1 %v1231_v26  ;;  %1284 = vmatpush.bf16.msra.mxu2 %v1231_v26 }
  0x6f   :  { %380 = vmatpush.bf16.msrb.mxu1 %v1230_v27  ;;  %1285 = vmatpush.bf16.msra.mxu2 %v1230_v27 }
  0x7a   :  { %1028 = vmatmul.msk.bf16.gmra.mxu0 %vm69_vm0, %v58_v32 }
  0x87   :  { %v103_v33 = vpop.f32.mrf.mxu0 }
  0x88   :  { %v104_v35 = vadd.f32 %v1447_v34, %v103_v33 }
  0x8a   :  { %v143_v38 = vmax.f32 %v104_v35, 0.0 }
  0x8f   :  { %v105_v36 = vpop.f32.mrf.mxu0 }
  0x90   :  { %v106_v37 = vadd.f32 %v1447_v34, %v105_v36  ;;  %v1468_v36 = vld [vmem:[%s1561_s3 + $0x1] ss:$0 sm:$0xff] }
  0x92   :  { %v144_v39 = vmax.f32 %v106_v37, 0.0 }
  0x94   :  { %v159_v40 = vpack.c.bf16 %v144_v39, %v143_v38 }
  0x96   :  { %241 = vmatmul.bf16.vlgmr.msra.gmra.mxu1 %v159_v40 }
  0x97   :  { %v108_v41 = vpop.f32.mrf.mxu0 }
  0x98   :  { %v109_v42 = vadd.f32 %v1447_v34, %v108_v41 }
  0x9a   :  { %v145_v45 = vmax.f32 %v109_v42, 0.0 }
  0x9f   :  { %v110_v43 = vpop.f32.mrf.mxu0 }
  0xa0   :  { %v111_v44 = vadd.f32 %v1447_v34, %v110_v43 }
  0xa2   :  { %v146_v46 = vmax.f32 %v111_v44, 0.0 }
  0xa4   :  { %v160_v47 = vpack.c.bf16 %v146_v46, %v145_v45 }
  0xa6   :  { %246 = vmatmul.bf16.gmra.mxu1 %v160_v47 }
  0xa7   :  { %v113_v48 = vpop.f32.mrf.mxu0 }
  0xa8   :  { %v114_v49 = vadd.f32 %v1447_v34, %v113_v48 }
  0xaa   :  { %v147_v52 = vmax.f32 %v114_v49, 0.0 }
  0xaf   :  { %v115_v50 = vpop.f32.mrf.mxu0 }
  0xb0   :  { %v116_v51 = vadd.f32 %v1447_v34, %v115_v50  ;;  %v1245_v50 = vld [vmem:[#allocation2 + $0xb8] sm:$0xff] }
  0xb1   :  { %513 = vmatpush.bf16.msrb.mxu3 %v1245_v50 }
  0xb2   :  { %v148_v53 = vmax.f32 %v116_v51, 0.0 }
  0xb4   :  { %v161_v54 = vpack.c.bf16 %v148_v53, %v147_v52 }
  0xb6   :  { %251 = vmatmul.bf16.vlgmr.msra.gmra.mxu3 %v161_v54 }
  0xb7   :  { %v118_v55 = vpop.f32.mrf.mxu0 }
  0xb8   :  { %v119_v56 = vadd.f32 %v1447_v34, %v118_v55 }
  0xba   :  { %v149_v59 = vmax.f32 %v119_v56, 0.0  ;;  %v1244_v56 = vld [vmem:[#allocation2 + $0xb0] sm:$0xff] }
  0xbb   :  { %514 = vmatpush.bf16.msrb.mxu3 %v1244_v56 }
  0xbf   :  { %v120_v57 = vpop.f32.mrf.mxu0 }
  0xc0   :  { %v121_v58 = vadd.f32 %v1447_v34, %v120_v57 }
  0xc2   :  { %v150_v60 = vmax.f32 %v121_v58, 0.0 }
  0xc4   :  { %v162_v61 = vpack.c.bf16 %v150_v60, %v149_v59 }
  0xc6   :  { %256 = vmatmul.bf16.gmra.mxu3 %v162_v61 }
  0xc7   :  { %v123_v62 = vpop.f32.mrf.mxu0 }
  0xc8   :  { %v124_v63 = vadd.f32 %v1447_v34, %v123_v62 }
  0xca   :  { %v151_v2 = vmax.f32 %v124_v63, 0.0 }
  0xcf   :  { %v125_v0 = vpop.f32.mrf.mxu0 }
  0xd0   :  { %v126_v1 = vadd.f32 %v1447_v34, %v125_v0  ;;  %v1243_v0 = vld [vmem:[#allocation2 + $0xa8] sm:$0xff] }
  0xd1   :  { %515 = vmatpush.bf16.msrb.mxu3 %v1243_v0 }
  0xd2   :  { %v152_v3 = vmax.f32 %v126_v1, 0.0 }
  0xd4   :  { %v163_v4 = vpack.c.bf16 %v152_v3, %v151_v2  ;;  %v1242_v3 = vld [vmem:[#allocation2 + $0xa0] sm:$0xff] }
  0xd5   :  { %516 = vmatpush.bf16.msrb.mxu3 %v1242_v3 }
  0xd6   :  { %261 = vmatmul.bf16.gmra.mxu3 %v163_v4 }
  0xd7   :  { %v128_v5 = vpop.f32.mrf.mxu0 }
  0xd8   :  { %v129_v6 = vadd.f32 %v1447_v34, %v128_v5 }
  0xda   :  { %v153_v10 = vmax.f32 %v129_v6, 0.0 }
  0xdf   :  { %v130_v7 = vpop.f32.mrf.mxu0 }
  0xe0   :  { %v131_v8 = vadd.f32 %v1447_v34, %v130_v7 }
  0xe2   :  { %v154_v11 = vmax.f32 %v131_v8, 0.0 }
  0xe4   :  { %v164_v12 = vpack.c.bf16 %v154_v11, %v153_v10  ;;  %v1241_v11 = vld [vmem:[#allocation2 + $0x98] sm:$0xff] }
  0xe5   :  { %517 = vmatpush.bf16.msrb.mxu3 %v1241_v11 }
  0xe6   :  { %266 = vmatmul.bf16.gmra.mxu3 %v164_v12 }
  0xe7   :  { %v133_v14 = vpop.f32.mrf.mxu0 }
  0xe8   :  { %v134_v17 = vadd.f32 %v1447_v34, %v133_v14 }
  0xea   :  { %v155_v21 = vmax.f32 %v134_v17, 0.0  ;;  %v1240_v17 = vld [vmem:[#allocation2 + $0x90] sm:$0xff] }
  0xeb   :  { %518 = vmatpush.bf16.msrb.mxu3 %v1240_v17 }
  0xef   :  { %v135_v18 = vpop.f32.mrf.mxu0 }
  0xf0   :  { %v136_v19 = vadd.f32 %v1447_v34, %v135_v18 }
  0xf2   :  { %v156_v22 = vmax.f32 %v136_v19, 0.0 }
  0xf4   :  { %v165_v23 = vpack.c.bf16 %v156_v22, %v155_v21 }
  0xf6   :  { %271 = vmatmul.bf16.gmra.mxu3 %v165_v23  ;;  %v1239_v23 = vld [vmem:[#allocation2 + $0x88] sm:$0xff] }
  0xf7   :  { %v138_v25 = vpop.f32.mrf.mxu0  ;;  %519 = vmatpush.bf16.msrb.mxu3 %v1239_v23 }
  0xf8   :  { %v139_v28 = vadd.f32 %v1447_v34, %v138_v25 }
  0xfa   :  { %v157_v31 = vmax.f32 %v139_v28, 0.0  ;;  %v1238_v28 = vld [vmem:[#allocation2 + $0x80] sm:$0xff] }
  0xfb   :  { %520 = vmatpush.bf16.msrb.mxu3 %v1238_v28 }
  0xff   :  { %v140_v29 = vpop.f32.mrf.mxu0 }
 0x100   :  { %v141_v30 = vadd.f32 %v1447_v34, %v140_v29 }
 0x102   :  { %v158_v32 = vmax.f32 %v141_v30, 0.0 }
 0x104   :  { %v166_v33 = vpack.c.bf16 %v158_v32, %v157_v31 }
 0x106   :  { %276 = vmatmul.bf16.gmra.mxu3 %v166_v33 }
 0x113   :  { %v242_v35 = vpop.f32.mrf.mxu1 }
 0x114   :  { %v243_v37 = vadd.f32 %v1468_v36, %v242_v35 }
 0x116   :  { %v282_v40 = vmax.f32 %v243_v37, 0.0 }
 0x11b   :  { %v244_v38 = vpop.f32.mrf.mxu1 }
 0x11c   :  { %v245_v39 = vadd.f32 %v1468_v36, %v244_v38  ;;  %v1489_v38 = vld [vmem:[%s1561_s3 + $0x2] ss:$0 sm:$0xff] }
 0x11e   :  { %v283_v41 = vmax.f32 %v245_v39, 0.0 }
 0x120   :  { %v298_v42 = vpack.c.bf16 %v283_v41, %v282_v40 }
 0x122   :  { %381 = vmatmul.bf16.vlgmr.msrb.gmra.mxu1 %v298_v42 }
 0x123   :  { %v247_v34 = vpop.f32.mrf.mxu1 }
 0x124   :  { %v248_v43 = vadd.f32 %v1468_v36, %v247_v34 }
 0x126   :  { %v284_v46 = vmax.f32 %v248_v43, 0.0 }
 0x12b   :  { %v249_v44 = vpop.f32.mrf.mxu1 }
 0x12c   :  { %v250_v45 = vadd.f32 %v1468_v36, %v249_v44 }
 0x12e   :  { %v285_v47 = vmax.f32 %v250_v45, 0.0 }
 0x130   :  { %v299_v48 = vpack.c.bf16 %v285_v47, %v284_v46 }
 0x132   :  { %386 = vmatmul.bf16.gmra.mxu1 %v299_v48 }
 0x139   :  { %v252_v49 = vpop.f32.mrf.mxu3 }
 0x13a   :  { %v253_v51 = vadd.f32 %v1468_v36, %v252_v49 }
 0x13c   :  { %v286_v54 = vmax.f32 %v253_v51, 0.0  ;;  %v1252_v51 = vld [vmem:[#allocation2 + $0xf0] sm:$0xff] }
 0x141   :  { %v254_v52 = vpop.f32.mrf.mxu3 }
 0x142   :  { %v255_v53 = vadd.f32 %v1468_v36, %v254_v52 }
 0x144   :  { %v287_v55 = vmax.f32 %v255_v53, 0.0  ;;  %v1251_v53 = vld [vmem:[#allocation2 + $0xe8] sm:$0xff] }
 0x146   :  { %v300_v57 = vpack.c.bf16 %v287_v55, %v286_v54 }
 0x148   :  { %391 = vmatmul.bf16.vlgmr.msra.gmra.mxu2 %v300_v57 }
 0x149   :  { %v257_v58 = vpop.f32.mrf.mxu3 }
 0x14a   :  { %v258_v59 = vadd.f32 %v1468_v36, %v257_v58 }
 0x14c   :  { %v288_v62 = vmax.f32 %v258_v59, 0.0 }
 0x151   :  { %v259_v60 = vpop.f32.mrf.mxu3 }
 0x152   :  { %v260_v61 = vadd.f32 %v1468_v36, %v259_v60 }
 0x154   :  { %v289_v63 = vmax.f32 %v260_v61, 0.0  ;;  %v1250_v61 = vld [vmem:[#allocation2 + $0xe0] sm:$0xff] }
 0x156   :  { %v301_v1 = vpack.c.bf16 %v289_v63, %v288_v62 }
 0x158   :  { %396 = vmatmul.bf16.gmra.mxu2 %v301_v1 }
 0x159   :  { %v262_v2 = vpop.f32.mrf.mxu3 }
 0x15a   :  { %v263_v4 = vadd.f32 %v1468_v36, %v262_v2 }
 0x15c   :  { %v290_v7 = vmax.f32 %v263_v4, 0.0 }
 0x161   :  { %v264_v5 = vpop.f32.mrf.mxu3 }
 0x162   :  { %v265_v6 = vadd.f32 %v1468_v36, %v264_v5  ;;  %v1249_v5 = vld [vmem:[#allocation2 + $0xd8] sm:$0xff] }
 0x164   :  { %v291_v8 = vmax.f32 %v265_v6, 0.0 }
 0x166   :  { %v302_v9 = vpack.c.bf16 %v291_v8, %v290_v7 }
 0x168   :  { %401 = vmatmul.bf16.gmra.mxu2 %v302_v9 }
 0x169   :  { %v267_v10 = vpop.f32.mrf.mxu3 }
 0x16a   :  { %v268_v12 = vadd.f32 %v1468_v36, %v267_v10 }
 0x16c   :  { %v292_v15 = vmax.f32 %v268_v12, 0.0 }
 0x171   :  { %v269_v13 = vpop.f32.mrf.mxu3 }
 0x172   :  { %v270_v14 = vadd.f32 %v1468_v36, %v269_v13  ;;  %v1248_v13 = vld [vmem:[#allocation2 + $0xd0] sm:$0xff] }
 0x174   :  { %v293_v16 = vmax.f32 %v270_v14, 0.0 }
 0x176   :  { %v303_v18 = vpack.c.bf16 %v293_v16, %v292_v15 }
 0x178   :  { %406 = vmatmul.bf16.gmra.mxu2 %v303_v18 }
 0x179   :  { %v272_v19 = vpop.f32.mrf.mxu3 }
 0x17a   :  { %v273_v20 = vadd.f32 %v1468_v36, %v272_v19 }
 0x17c   :  { %v294_v24 = vmax.f32 %v273_v20, 0.0  ;;  %v1247_v20 = vld [vmem:[#allocation2 + $0xc8] sm:$0xff] }
 0x181   :  { %v274_v21 = vpop.f32.mrf.mxu3 }
 0x182   :  { %v275_v22 = vadd.f32 %v1468_v36, %v274_v21 }
 0x184   :  { %v295_v25 = vmax.f32 %v275_v22, 0.0 }
 0x186   :  { %v304_v26 = vpack.c.bf16 %v295_v25, %v294_v24 }
 0x188   :  { %411 = vmatmul.bf16.gmra.mxu2 %v304_v26 }
 0x189   :  { %v277_v27 = vpop.f32.mrf.mxu3 }
 0x18a   :  { %v278_v29 = vadd.f32 %v1468_v36, %v277_v27 }
 0x18c   :  { %v296_v32 = vmax.f32 %v278_v29, 0.0  ;;  %v1246_v29 = vld [vmem:[#allocation2 + $0xc0] sm:$0xff] }
 0x191   :  { %v279_v30 = vpop.f32.mrf.mxu3 }
 0x192   :  { %v280_v31 = vadd.f32 %v1468_v36, %v279_v30  ;;  %v1253_v36 = vld [vmem:[#allocation2 + $0xf8] sm:$0xff] }
 0x193   :  { %653 = vmatpush.bf16.msrb.mxu0 %v1253_v36 }
 0x194   :  { %v297_v33 = vmax.f32 %v280_v31, 0.0 }
 0x196   :  { %v305_v35 = vpack.c.bf16 %v297_v33, %v296_v32 }
 0x197   :  { %654 = vmatpush.bf16.msrb.mxu0 %v1252_v51 }
 0x198   :  { %416 = vmatmul.bf16.gmra.mxu2 %v305_v35 }
 0x19b   :  { %655 = vmatpush.bf16.msrb.mxu0 %v1251_v53 }
 0x19f   :  { %v382_v37 = vpop.f32.mrf.mxu1  ;;  %656 = vmatpush.bf16.msrb.mxu0 %v1250_v61 }
 0x1a0   :  { %v383_v39 = vadd.f32 %v1489_v38, %v382_v37 }
 0x1a2   :  { %v422_v42 = vmax.f32 %v383_v39, 0.0 }
 0x1a3   :  { %657 = vmatpush.bf16.msrb.mxu0 %v1249_v5 }
 0x1a7   :  { %v384_v40 = vpop.f32.mrf.mxu1  ;;  %658 = vmatpush.bf16.msrb.mxu0 %v1248_v13 }
 0x1a8   :  { %v385_v41 = vadd.f32 %v1489_v38, %v384_v40  ;;  %v1510_v40 = vld [vmem:[%s1561_s3 + $0x3] ss:$0 sm:$0xff] }
 0x1aa   :  { %v423_v34 = vmax.f32 %v385_v41, 0.0 }
 0x1ab   :  { %659 = vmatpush.bf16.msrb.mxu0 %v1247_v20 }
 0x1ac   :  { %v438_v43 = vpack.c.bf16 %v423_v34, %v422_v42 }
 0x1ae   :  { %521 = vmatmul.bf16.vlgmr.msrb.gmra.mxu3 %v438_v43 }
 0x1af   :  { %v387_v44 = vpop.f32.mrf.mxu1  ;;  %660 = vmatpush.bf16.msrb.mxu0 %v1246_v29 }
 0x1b0   :  { %v388_v45 = vadd.f32 %v1489_v38, %v387_v44 }
 0x1b2   :  { %v424_v48 = vmax.f32 %v388_v45, 0.0 }
 0x1b7   :  { %v389_v46 = vpop.f32.mrf.mxu1 }
 0x1b8   :  { %v390_v47 = vadd.f32 %v1489_v38, %v389_v46 }
 0x1ba   :  { %v425_v49 = vmax.f32 %v390_v47, 0.0 }
 0x1bc   :  { %v439_v50 = vpack.c.bf16 %v425_v49, %v424_v48 }
 0x1be   :  { %526 = vmatmul.bf16.gmra.mxu3 %v439_v50 }
 0x1cb   :  { %v392_v52 = vpop.f32.mrf.mxu2 }
 0x1cc   :  { %v393_v54 = vadd.f32 %v1489_v38, %v392_v52 }
 0x1ce   :  { %v426_v57 = vmax.f32 %v393_v54, 0.0 }
 0x1d3   :  { %v394_v55 = vpop.f32.mrf.mxu2 }
 0x1d4   :  { %v395_v56 = vadd.f32 %v1489_v38, %v394_v55 }
 0x1d6   :  { %v427_v58 = vmax.f32 %v395_v56, 0.0 }
 0x1d8   :  { %v440_v59 = vpack.c.bf16 %v427_v58, %v426_v57 }
 0x1da   :  { %531 = vmatmul.bf16.gmra.mxu3 %v440_v59 }
 0x1db   :  { %v397_v60 = vpop.f32.mrf.mxu2 }
 0x1dc   :  { %v398_v62 = vadd.f32 %v1489_v38, %v397_v60 }
 0x1de   :  { %v428_v1 = vmax.f32 %v398_v62, 0.0 }
 0x1e3   :  { %v399_v63 = vpop.f32.mrf.mxu2 }
 0x1e4   :  { %v400_v0 = vadd.f32 %v1489_v38, %v399_v63 }
 0x1e6   :  { %v429_v2 = vmax.f32 %v400_v0, 0.0 }
 0x1e8   :  { %v441_v3 = vpack.c.bf16 %v429_v2, %v428_v1 }
 0x1ea   :  { %536 = vmatmul.bf16.gmra.mxu3 %v441_v3 }
 0x1eb   :  { %v402_v4 = vpop.f32.mrf.mxu2 }
 0x1ec   :  { %v403_v6 = vadd.f32 %v1489_v38, %v402_v4 }
 0x1ee   :  { %v430_v9 = vmax.f32 %v403_v6, 0.0 }
 0x1f3   :  { %v404_v7 = vpop.f32.mrf.mxu2 }
 0x1f4   :  { %v405_v8 = vadd.f32 %v1489_v38, %v404_v7 }
 0x1f6   :  { %v431_v10 = vmax.f32 %v405_v8, 0.0  ;;  %v1261_v8 = vld [vmem:[#allocation2 + $0x138] sm:$0xff] }
 0x1f7   :  { %793 = vmatpush.bf16.msra.mxu1 %v1261_v8 }
 0x1f8   :  { %v442_v11 = vpack.c.bf16 %v431_v10, %v430_v9  ;;  %v1260_v10 = vld [vmem:[#allocation2 + $0x130] sm:$0xff] }
 0x1fa   :  { %541 = vmatmul.bf16.gmra.mxu3 %v442_v11  ;;  %v1259_v11 = vld [vmem:[#allocation2 + $0x128] sm:$0xff] }
 0x1fb   :  { %v407_v12 = vpop.f32.mrf.mxu2  ;;  %794 = vmatpush.bf16.msra.mxu1 %v1260_v10 }
 0x1fc   :  { %v408_v14 = vadd.f32 %v1489_v38, %v407_v12 }
 0x1fe   :  { %v432_v17 = vmax.f32 %v408_v14, 0.0 }
 0x1ff   :  { %795 = vmatpush.bf16.msra.mxu1 %v1259_v11 }
 0x203   :  { %v409_v15 = vpop.f32.mrf.mxu2 }
 0x204   :  { %v410_v16 = vadd.f32 %v1489_v38, %v409_v15  ;;  %v1258_v15 = vld [vmem:[#allocation2 + $0x120] sm:$0xff] }
 0x205   :  { %796 = vmatpush.bf16.msra.mxu1 %v1258_v15  ;;  %v1264_v15 = vld [vmem:[#allocation2 + $0x150] sm:$0xff] }
 0x206   :  { %v433_v18 = vmax.f32 %v410_v16, 0.0 }
 0x208   :  { %v443_v19 = vpack.c.bf16 %v433_v18, %v432_v17 }
 0x20a   :  { %546 = vmatmul.bf16.gmra.mxu3 %v443_v19  ;;  %v1257_v19 = vld [vmem:[#allocation2 + $0x118] sm:$0xff] }
 0x20b   :  { %v412_v21 = vpop.f32.mrf.mxu2  ;;  %797 = vmatpush.bf16.msra.mxu1 %v1257_v19 }
 0x20c   :  { %v413_v22 = vadd.f32 %v1489_v38, %v412_v21  ;;  %v1256_v21 = vld [vmem:[#allocation2 + $0x110] sm:$0xff] }
 0x20e   :  { %v434_v25 = vmax.f32 %v413_v22, 0.0  ;;  %v1255_v22 = vld [vmem:[#allocation2 + $0x108] sm:$0xff] }
 0x20f   :  { %798 = vmatpush.bf16.msra.mxu1 %v1256_v21 }
 0x213   :  { %v414_v23 = vpop.f32.mrf.mxu2  ;;  %799 = vmatpush.bf16.msra.mxu1 %v1255_v22 }
 0x214   :  { %v415_v24 = vadd.f32 %v1489_v38, %v414_v23 }
 0x216   :  { %v435_v26 = vmax.f32 %v415_v24, 0.0 }
 0x218   :  { %v444_v27 = vpack.c.bf16 %v435_v26, %v434_v25  ;;  %v1254_v26 = vld [vmem:[#allocation2 + $0x100] sm:$0xff] }
 0x219   :  { %800 = vmatpush.bf16.msra.mxu1 %v1254_v26 }
 0x21a   :  { %551 = vmatmul.bf16.gmra.mxu3 %v444_v27 }
 0x21b   :  { %v417_v28 = vpop.f32.mrf.mxu2 }
 0x21c   :  { %v418_v30 = vadd.f32 %v1489_v38, %v417_v28 }
 0x21e   :  { %v436_v33 = vmax.f32 %v418_v30, 0.0 }
 0x223   :  { %v419_v31 = vpop.f32.mrf.mxu2 }
 0x224   :  { %v420_v32 = vadd.f32 %v1489_v38, %v419_v31 }
 0x226   :  { %v437_v35 = vmax.f32 %v420_v32, 0.0 }
 0x228   :  { %v445_v37 = vpack.c.bf16 %v437_v35, %v436_v33 }
 0x22a   :  { %556 = vmatmul.bf16.gmra.mxu3 %v445_v37 }
 0x231   :  { %v522_v39 = vpop.f32.mrf.mxu3 }
 0x232   :  { %v523_v41 = vadd.f32 %v1510_v40, %v522_v39 }
 0x234   :  { %v562_v43 = vmax.f32 %v523_v41, 0.0 }
 0x239   :  { %v524_v42 = vpop.f32.mrf.mxu3 }
 0x23a   :  { %v525_v34 = vadd.f32 %v1510_v40, %v524_v42  ;;  %v1531_v42 = vld [vmem:[%s1561_s3 + $0x4] ss:$0 sm:$0xff] }
 0x23c   :  { %v563_v36 = vmax.f32 %v525_v34, 0.0 }
 0x23e   :  { %v578_v44 = vpack.c.bf16 %v563_v36, %v562_v43 }
 0x240   :  { %661 = vmatmul.bf16.vlgmr.msrb.gmra.mxu0 %v578_v44 }
 0x241   :  { %v527_v38 = vpop.f32.mrf.mxu3 }
 0x242   :  { %v528_v45 = vadd.f32 %v1510_v40, %v527_v38 }
 0x244   :  { %v564_v48 = vmax.f32 %v528_v45, 0.0 }
 0x249   :  { %v529_v46 = vpop.f32.mrf.mxu3 }
 0x24a   :  { %v530_v47 = vadd.f32 %v1510_v40, %v529_v46 }
 0x24c   :  { %v565_v49 = vmax.f32 %v530_v47, 0.0 }
 0x24e   :  { %v579_v50 = vpack.c.bf16 %v565_v49, %v564_v48 }
 0x250   :  { %666 = vmatmul.bf16.gmra.mxu0 %v579_v50 }
 0x25d   :  { %v532_v51 = vpop.f32.mrf.mxu3 }
 0x25e   :  { %v533_v52 = vadd.f32 %v1510_v40, %v532_v51 }
 0x260   :  { %v566_v55 = vmax.f32 %v533_v52, 0.0  ;;  %v1269_v52 = vld [vmem:[#allocation2 + $0x178] sm:$0xff] }
 0x261   :  { %933 = vmatpush.bf16.msrb.mxu2 %v1269_v52 }
 0x265   :  { %v534_v53 = vpop.f32.mrf.mxu3 }
 0x266   :  { %v535_v54 = vadd.f32 %v1510_v40, %v534_v53 }
 0x268   :  { %v567_v56 = vmax.f32 %v535_v54, 0.0  ;;  %v1268_v54 = vld [vmem:[#allocation2 + $0x170] sm:$0xff] }
 0x269   :  { %934 = vmatpush.bf16.msrb.mxu2 %v1268_v54 }
 0x26a   :  { %v580_v57 = vpack.c.bf16 %v567_v56, %v566_v55 }
 0x26c   :  { %671 = vmatmul.bf16.gmra.mxu0 %v580_v57 }
 0x26d   :  { %v537_v58 = vpop.f32.mrf.mxu3 }
 0x26e   :  { %v538_v59 = vadd.f32 %v1510_v40, %v537_v58 }
 0x270   :  { %v568_v62 = vmax.f32 %v538_v59, 0.0 }
 0x275   :  { %v539_v60 = vpop.f32.mrf.mxu3 }
 0x276   :  { %v540_v61 = vadd.f32 %v1510_v40, %v539_v60 }
 0x278   :  { %v569_v63 = vmax.f32 %v540_v61, 0.0 }
 0x27a   :  { %v581_v0 = vpack.c.bf16 %v569_v63, %v568_v62  ;;  %v1267_v62 = vld [vmem:[#allocation2 + $0x168] sm:$0xff] }
 0x27b   :  { %935 = vmatpush.bf16.msrb.mxu2 %v1267_v62 }
 0x27c   :  { %676 = vmatmul.bf16.gmra.mxu0 %v581_v0 }
 0x27d   :  { %v542_v1 = vpop.f32.mrf.mxu3 }
 0x27e   :  { %v543_v2 = vadd.f32 %v1510_v40, %v542_v1 }
 0x280   :  { %v570_v5 = vmax.f32 %v543_v2, 0.0 }
 0x285   :  { %v544_v3 = vpop.f32.mrf.mxu3 }
 0x286   :  { %v545_v4 = vadd.f32 %v1510_v40, %v544_v3 }
 0x288   :  { %v571_v6 = vmax.f32 %v545_v4, 0.0 }
 0x28a   :  { %v582_v7 = vpack.c.bf16 %v571_v6, %v570_v5  ;;  %v1266_v5 = vld [vmem:[#allocation2 + $0x160] sm:$0xff] }
 0x28b   :  { %936 = vmatpush.bf16.msrb.mxu2 %v1266_v5 }
 0x28c   :  { %681 = vmatmul.bf16.gmra.mxu0 %v582_v7 }
 0x28d   :  { %v547_v9 = vpop.f32.mrf.mxu3 }
 0x28e   :  { %v548_v12 = vadd.f32 %v1510_v40, %v547_v9 }
 0x290   :  { %v572_v16 = vmax.f32 %v548_v12, 0.0  ;;  %v1265_v12 = vld [vmem:[#allocation2 + $0x158] sm:$0xff] }
 0x291   :  { %937 = vmatpush.bf16.msrb.mxu2 %v1265_v12 }
 0x295   :  { %v549_v13 = vpop.f32.mrf.mxu3  ;;  %938 = vmatpush.bf16.msrb.mxu2 %v1264_v15 }
 0x296   :  { %v550_v14 = vadd.f32 %v1510_v40, %v549_v13 }
 0x298   :  { %v573_v17 = vmax.f32 %v550_v14, 0.0 }
 0x29a   :  { %v583_v18 = vpack.c.bf16 %v573_v17, %v572_v16 }
 0x29c   :  { %686 = vmatmul.bf16.gmra.mxu0 %v583_v18 }
 0x29d   :  { %v552_v20 = vpop.f32.mrf.mxu3 }
 0x29e   :  { %v553_v23 = vadd.f32 %v1510_v40, %v552_v20 }
 0x2a0   :  { %v574_v27 = vmax.f32 %v553_v23, 0.0  ;;  %v1263_v23 = vld [vmem:[#allocation2 + $0x148] sm:$0xff] }
 0x2a1   :  { %939 = vmatpush.bf16.msrb.mxu2 %v1263_v23 }
 0x2a5   :  { %v554_v24 = vpop.f32.mrf.mxu3 }
 0x2a6   :  { %v555_v25 = vadd.f32 %v1510_v40, %v554_v24 }
 0x2a8   :  { %v575_v28 = vmax.f32 %v555_v25, 0.0 }
 0x2aa   :  { %v584_v29 = vpack.c.bf16 %v575_v28, %v574_v27  ;;  %v1262_v27 = vld [vmem:[#allocation2 + $0x140] sm:$0xff] }
 0x2ab   :  { %940 = vmatpush.bf16.msrb.mxu2 %v1262_v27 }
 0x2ac   :  { %691 = vmatmul.bf16.gmra.mxu0 %v584_v29 }
 0x2ad   :  { %v557_v30 = vpop.f32.mrf.mxu3 }
 0x2ae   :  { %v558_v31 = vadd.f32 %v1510_v40, %v557_v30 }
 0x2b0   :  { %v576_v35 = vmax.f32 %v558_v31, 0.0 }
 0x2b5   :  { %v559_v32 = vpop.f32.mrf.mxu3 }
 0x2b6   :  { %v560_v33 = vadd.f32 %v1510_v40, %v559_v32 }
 0x2b8   :  { %v577_v37 = vmax.f32 %v560_v33, 0.0 }
 0x2ba   :  { %v585_v39 = vpack.c.bf16 %v577_v37, %v576_v35 }
 0x2bc   :  { %696 = vmatmul.bf16.gmra.mxu0 %v585_v39 }
 0x2bd   :  { %v662_v41 = vpop.f32.mrf.mxu0 }
 0x2be   :  { %v663_v34 = vadd.f32 %v1531_v42, %v662_v41 }
 0x2c0   :  { %v702_v44 = vmax.f32 %v663_v34, 0.0 }
 0x2c5   :  { %v664_v43 = vpop.f32.mrf.mxu0 }
 0x2c6   :  { %v665_v36 = vadd.f32 %v1531_v42, %v664_v43  ;;  %v1297_v43 = vld [vmem:[%s1561_s3 + $0x5] ss:$0 sm:$0xff] }
 0x2c8   :  { %v703_v38 = vmax.f32 %v665_v36, 0.0 }
 0x2ca   :  { %v718_v45 = vpack.c.bf16 %v703_v38, %v702_v44 }
 0x2cc   :  { %801 = vmatmul.bf16.vlgmr.msra.gmra.mxu1 %v718_v45 }
 0x2cd   :  { %v667_v40 = vpop.f32.mrf.mxu0 }
 0x2ce   :  { %v668_v46 = vadd.f32 %v1531_v42, %v667_v40 }
 0x2d0   :  { %v704_v49 = vmax.f32 %v668_v46, 0.0 }
 0x2d5   :  { %v669_v47 = vpop.f32.mrf.mxu0 }
 0x2d6   :  { %v670_v48 = vadd.f32 %v1531_v42, %v669_v47 }
 0x2d8   :  { %v705_v50 = vmax.f32 %v670_v48, 0.0 }
 0x2da   :  { %v719_v51 = vpack.c.bf16 %v705_v50, %v704_v49 }
 0x2dc   :  { %806 = vmatmul.bf16.gmra.mxu1 %v719_v51 }
 0x2e9   :  { %v672_v53 = vpop.f32.mrf.mxu0 }
 0x2ea   :  { %v673_v55 = vadd.f32 %v1531_v42, %v672_v53 }
 0x2ec   :  { %v706_v58 = vmax.f32 %v673_v55, 0.0 }
 0x2f1   :  { %v674_v56 = vpop.f32.mrf.mxu0 }
 0x2f2   :  { %v675_v57 = vadd.f32 %v1531_v42, %v674_v56 }
 0x2f4   :  { %v707_v59 = vmax.f32 %v675_v57, 0.0 }
 0x2f6   :  { %v720_v60 = vpack.c.bf16 %v707_v59, %v706_v58 }
 0x2f8   :  { %811 = vmatmul.bf16.gmra.mxu1 %v720_v60 }
 0x2f9   :  { %v677_v61 = vpop.f32.mrf.mxu0 }
 0x2fa   :  { %v678_v63 = vadd.f32 %v1531_v42, %v677_v61 }
 0x2fc   :  { %v708_v2 = vmax.f32 %v678_v63, 0.0 }
 0x301   :  { %v679_v0 = vpop.f32.mrf.mxu0 }
 0x302   :  { %v680_v1 = vadd.f32 %v1531_v42, %v679_v0 }
 0x304   :  { %v709_v3 = vmax.f32 %v680_v1, 0.0 }
 0x306   :  { %v721_v4 = vpack.c.bf16 %v709_v3, %v708_v2 }
 0x308   :  { %816 = vmatmul.bf16.gmra.mxu1 %v721_v4 }
 0x309   :  { %v682_v6 = vpop.f32.mrf.mxu0 }
 0x30a   :  { %v683_v7 = vadd.f32 %v1531_v42, %v682_v6 }
 0x30c   :  { %v710_v10 = vmax.f32 %v683_v7, 0.0 }
 0x311   :  { %v684_v8 = vpop.f32.mrf.mxu0 }
 0x312   :  { %v685_v9 = vadd.f32 %v1531_v42, %v684_v8 }
 0x314   :  { %v711_v11 = vmax.f32 %v685_v9, 0.0 }
 0x316   :  { %v722_v13 = vpack.c.bf16 %v711_v11, %v710_v10 }
 0x318   :  { %821 = vmatmul.bf16.gmra.mxu1 %v722_v13 }
 0x319   :  { %v687_v14 = vpop.f32.mrf.mxu0 }
 0x31a   :  { %v688_v16 = vadd.f32 %v1531_v42, %v687_v14 }
 0x31c   :  { %v712_v19 = vmax.f32 %v688_v16, 0.0 }
 0x321   :  { %v689_v17 = vpop.f32.mrf.mxu0 }
 0x322   :  { %v690_v18 = vadd.f32 %v1531_v42, %v689_v17 }
 0x324   :  { %v713_v20 = vmax.f32 %v690_v18, 0.0 }
 0x326   :  { %v723_v21 = vpack.c.bf16 %v713_v20, %v712_v19 }
 0x328   :  { %826 = vmatmul.bf16.gmra.mxu1 %v723_v21 }
 0x329   :  { %v692_v22 = vpop.f32.mrf.mxu0 }
 0x32a   :  { %v693_v24 = vadd.f32 %v1531_v42, %v692_v22 }
 0x32c   :  { %v714_v28 = vmax.f32 %v693_v24, 0.0 }
 0x331   :  { %v694_v25 = vpop.f32.mrf.mxu0 }
 0x332   :  { %v695_v26 = vadd.f32 %v1531_v42, %v694_v25 }
 0x334   :  { %v715_v29 = vmax.f32 %v695_v26, 0.0 }
 0x336   :  { %v724_v30 = vpack.c.bf16 %v715_v29, %v714_v28 }
 0x338   :  { %831 = vmatmul.bf16.gmra.mxu1 %v724_v30 }
 0x339   :  { %v697_v31 = vpop.f32.mrf.mxu0 }
 0x33a   :  { %v698_v32 = vadd.f32 %v1531_v42, %v697_v31  ;;  %v1298_v31 = vld [vmem:[%s1561_s3 + $0x6] ss:$0 sm:$0xff]  ;;  %s1354_s3 = smov [#allocation5]  }
 0x33b   :  { %s1002_s13 = sshll.u32 %s1354_s3, 4  ;;  %s1003_s13 = int_to_ptr.vmem [resolvable:$true] %s1002_s13 }
 0x33c   :  { %v716_v37 = vmax.f32 %v698_v32, 0.0 }
 0x341   :  { %v699_v33 = vpop.f32.mrf.mxu0 }
 0x342   :  { %v700_v35 = vadd.f32 %v1531_v42, %v699_v33 }
 0x344   :  { %v717_v39 = vmax.f32 %v700_v35, 0.0 }
 0x346   :  { %v725_v41 = vpack.c.bf16 %v717_v39, %v716_v37 }
 0x348   :  { %836 = vmatmul.bf16.gmra.mxu1 %v725_v41 }
 0x349   :  { %v802_v34 = vpop.f32.mrf.mxu1 }
 0x34a   :  { %v803_v36 = vadd.f32 %v1297_v43, %v802_v34 }
 0x34c   :  { %v842_v45 = vmax.f32 %v803_v36, 0.0 }
 0x351   :  { %v804_v44 = vpop.f32.mrf.mxu1 }
 0x352   :  { %v805_v38 = vadd.f32 %v1297_v43, %v804_v44 }
 0x354   :  { %v843_v40 = vmax.f32 %v805_v38, 0.0 }
 0x356   :  { %v858_v46 = vpack.c.bf16 %v843_v40, %v842_v45 }
 0x358   :  { %941 = vmatmul.bf16.vlgmr.msrb.gmra.mxu2 %v858_v46 }
 0x359   :  { %v807_v47 = vpop.f32.mrf.mxu1 }
 0x35a   :  { %v808_v48 = vadd.f32 %v1297_v43, %v807_v47 }
 0x35c   :  { %v844_v50 = vmax.f32 %v808_v48, 0.0 }
 0x361   :  { %v809_v49 = vpop.f32.mrf.mxu1 }
 0x362   :  { %v810_v42 = vadd.f32 %v1297_v43, %v809_v49 }
 0x364   :  { %v845_v51 = vmax.f32 %v810_v42, 0.0 }
 0x366   :  { %v859_v52 = vpack.c.bf16 %v845_v51, %v844_v50 }
 0x368   :  { %946 = vmatmul.bf16.gmra.mxu2 %v859_v52 }
 0x375   :  { %v812_v53 = vpop.f32.mrf.mxu1 }
 0x376   :  { %v813_v54 = vadd.f32 %v1297_v43, %v812_v53 }
 0x378   :  { %v846_v57 = vmax.f32 %v813_v54, 0.0 }
 0x37d   :  { %v814_v55 = vpop.f32.mrf.mxu1 }
 0x37e   :  { %v815_v56 = vadd.f32 %v1297_v43, %v814_v55 }
 0x380   :  { %v847_v58 = vmax.f32 %v815_v56, 0.0 }
 0x382   :  { %v860_v59 = vpack.c.bf16 %v847_v58, %v846_v57 }
 0x384   :  { %951 = vmatmul.bf16.gmra.mxu2 %v860_v59 }
 0x385   :  { %v817_v60 = vpop.f32.mrf.mxu1 }
 0x386   :  { %v818_v61 = vadd.f32 %v1297_v43, %v817_v60 }
 0x388   :  { %v848_v0 = vmax.f32 %v818_v61, 0.0 }
 0x38d   :  { %v819_v62 = vpop.f32.mrf.mxu1 }
 0x38e   :  { %v820_v63 = vadd.f32 %v1297_v43, %v819_v62 }
 0x390   :  { %v849_v1 = vmax.f32 %v820_v63, 0.0 }
 0x392   :  { %v861_v2 = vpack.c.bf16 %v849_v1, %v848_v0 }
 0x394   :  { %956 = vmatmul.bf16.gmra.mxu2 %v861_v2 }
 0x395   :  { %v822_v3 = vpop.f32.mrf.mxu1 }
 0x396   :  { %v823_v4 = vadd.f32 %v1297_v43, %v822_v3 }
 0x398   :  { %v850_v7 = vmax.f32 %v823_v4, 0.0 }
 0x39d   :  { %v824_v5 = vpop.f32.mrf.mxu1 }
 0x39e   :  { %v825_v6 = vadd.f32 %v1297_v43, %v824_v5 }
 0x3a0   :  { %v851_v8 = vmax.f32 %v825_v6, 0.0 }
 0x3a2   :  { %v862_v9 = vpack.c.bf16 %v851_v8, %v850_v7 }
 0x3a4   :  { %961 = vmatmul.bf16.gmra.mxu2 %v862_v9 }
 0x3a5   :  { %v827_v10 = vpop.f32.mrf.mxu1 }
 0x3a6   :  { %v828_v11 = vadd.f32 %v1297_v43, %v827_v10 }
 0x3a8   :  { %v852_v14 = vmax.f32 %v828_v11, 0.0 }
 0x3ad   :  { %v829_v12 = vpop.f32.mrf.mxu1 }
 0x3ae   :  { %v830_v13 = vadd.f32 %v1297_v43, %v829_v12 }
 0x3b0   :  { %v853_v15 = vmax.f32 %v830_v13, 0.0 }
 0x3b2   :  { %v863_v16 = vpack.c.bf16 %v853_v15, %v852_v14 }
 0x3b4   :  { %966 = vmatmul.bf16.gmra.mxu2 %v863_v16 }
 0x3b5   :  { %v832_v17 = vpop.f32.mrf.mxu1 }
 0x3b6   :  { %v833_v18 = vadd.f32 %v1297_v43, %v832_v17 }
 0x3b8   :  { %v854_v21 = vmax.f32 %v833_v18, 0.0 }
 0x3bd   :  { %v834_v19 = vpop.f32.mrf.mxu1 }
 0x3be   :  { %v835_v20 = vadd.f32 %v1297_v43, %v834_v19 }
 0x3c0   :  { %v855_v22 = vmax.f32 %v835_v20, 0.0 }
 0x3c2   :  { %v864_v23 = vpack.c.bf16 %v855_v22, %v854_v21 }
 0x3c4   :  { %971 = vmatmul.bf16.gmra.mxu2 %v864_v23 }
 0x3c5   :  { %v837_v24 = vpop.f32.mrf.mxu1 }
 0x3c6   :  { %v838_v25 = vadd.f32 %v1297_v43, %v837_v24 }
 0x3c8   :  { %v856_v28 = vmax.f32 %v838_v25, 0.0 }
 0x3cd   :  { %v839_v26 = vpop.f32.mrf.mxu1 }
 0x3ce   :  { %v840_v27 = vadd.f32 %v1297_v43, %v839_v26 }
 0x3d0   :  { %v857_v29 = vmax.f32 %v840_v27, 0.0 }
 0x3d2   :  { %v865_v30 = vpack.c.bf16 %v857_v29, %v856_v28 }
 0x3d4   :  { %976 = vmatmul.bf16.gmra.mxu2 %v865_v30 }
 0x3db   :  { %v942_v32 = vpop.f32.mrf.mxu2 }
 0x3dc   :  { %v943_v33 = vadd.f32 %v1298_v31, %v942_v32 }
 0x3de   :  { %982 = vst [vmem:[#allocation5] sm:$0xff] %v943_v33 }
 0x3e3   :  { %v944_v35 = vpop.f32.mrf.mxu2 }
 0x3e4   :  { %v945_v37 = vadd.f32 %v1298_v31, %v944_v35 }
 0x3e6   :  { %983 = vst [vmem:[#allocation5 + $0x8] sm:$0xff] %v945_v37 }
 0x3eb   :  { %v947_v39 = vpop.f32.mrf.mxu2 }
 0x3ec   :  { %v948_v41 = vadd.f32 %v1298_v31, %v947_v39 }
 0x3ee   :  { %984 = vst [vmem:[#allocation5 + $0x10] sm:$0xff] %v948_v41 }
 0x3f3   :  { %v949_v34 = vpop.f32.mrf.mxu2 }
 0x3f4   :  { %v950_v36 = vadd.f32 %v1298_v31, %v949_v34 }
 0x3f6   :  { %985 = vst [vmem:[#allocation5 + $0x18] sm:$0xff] %v950_v36 }
 0x407   :  { %v952_v43 = vpop.f32.mrf.mxu2 }
 0x408   :  { %v953_v44 = vadd.f32 %v1298_v31, %v952_v43 }
 0x40a   :  { %986 = vst [vmem:[#allocation5 + $0x20] sm:$0xff] %v953_v44 }
 0x40f   :  { %v954_v38 = vpop.f32.mrf.mxu2 }
 0x410   :  { %v955_v45 = vadd.f32 %v1298_v31, %v954_v38 }
 0x412   :  { %987 = vst [vmem:[#allocation5 + $0x28] sm:$0xff] %v955_v45 }
 0x417   :  { %v957_v40 = vpop.f32.mrf.mxu2 }
 0x418   :  { %v958_v46 = vadd.f32 %v1298_v31, %v957_v40 }
 0x41a   :  { %988 = vst [vmem:[#allocation5 + $0x30] sm:$0xff] %v958_v46 }
 0x41f   :  { %v959_v47 = vpop.f32.mrf.mxu2 }
 0x420   :  { %v960_v48 = vadd.f32 %v1298_v31, %v959_v47 }
 0x422   :  { %989 = vst [vmem:[#allocation5 + $0x38] sm:$0xff] %v960_v48 }
 0x427   :  { %v962_v49 = vpop.f32.mrf.mxu2 }
 0x428   :  { %v963_v42 = vadd.f32 %v1298_v31, %v962_v49 }
 0x42a   :  { %990 = vst [vmem:[#allocation5 + $0x40] sm:$0xff] %v963_v42 }
 0x42f   :  { %v964_v50 = vpop.f32.mrf.mxu2 }
 0x430   :  { %v965_v51 = vadd.f32 %v1298_v31, %v964_v50 }
 0x432   :  { %991 = vst [vmem:[#allocation5 + $0x48] sm:$0xff] %v965_v51 }
 0x437   :  { %v967_v52 = vpop.f32.mrf.mxu2 }
 0x438   :  { %v968_v53 = vadd.f32 %v1298_v31, %v967_v52 }
 0x43a   :  { %992 = vst [vmem:[#allocation5 + $0x50] sm:$0xff] %v968_v53 }
 0x43f   :  { %v969_v54 = vpop.f32.mrf.mxu2 }
 0x440   :  { %v970_v55 = vadd.f32 %v1298_v31, %v969_v54 }
 0x442   :  { %993 = vst [vmem:[#allocation5 + $0x58] sm:$0xff] %v970_v55 }
 0x447   :  { %v972_v56 = vpop.f32.mrf.mxu2 }
 0x448   :  { %v973_v57 = vadd.f32 %v1298_v31, %v972_v56 }
 0x44a   :  { %994 = vst [vmem:[#allocation5 + $0x60] sm:$0xff] %v973_v57 }
 0x44f   :  { %v974_v58 = vpop.f32.mrf.mxu2 }
 0x450   :  { %v975_v59 = vadd.f32 %v1298_v31, %v974_v58 }
 0x452   :  { %995 = vst [vmem:[#allocation5 + $0x68] sm:$0xff] %v975_v59 }
 0x457   :  { %v977_v60 = vpop.f32.mrf.mxu2 }
 0x458   :  { %v978_v61 = vadd.f32 %v1298_v31, %v977_v60 }
 0x45a   :  { %996 = vst [vmem:[#allocation5 + $0x70] sm:$0xff] %v978_v61 }
 0x45f   :  { %v979_v62 = vpop.f32.mrf.mxu2 }
 0x460   :  { %v980_v63 = vadd.f32 %v1298_v31, %v979_v62 }
 0x462   :  { %997 = vst [vmem:[#allocation5 + $0x78] sm:$0xff] %v980_v63 }
 0x463   :  { %1010 = dma.vmem_to_hbm [thread:$0]  %s1003_s13, 2048, %s1005_s16, [#allocation4], %s1355_s17, %s1355_s17, %s1356_s18  }
 0x464   :  { %1349 = dma.done.wait [#allocation4], 2048  }
 0x465   :  { %1350 = vsyncadd [#allocation4], 4294965248 }
 0x466   :  { %1015 = vsyncpa [#allocation3], 1 }
 0x467   :  { %1016 = vsyncpa [#allocation4], 1 }

</bundles_post_ra>
